<compile_context>
chip_gen: v7x
topology: tpu7x:2x2x1
jax: 0.10.0
libtpu: 0.0.40
codegen_flags: <defaults>
</compile_context>

<pallas_src>
import functools

import jax
import jax.numpy as jnp
from jax import lax
from jax.experimental import pallas as pl
from jax.experimental.pallas import tpu as pltpu


# ------------------------------ shared math ---------------------------------

def _sigmoid(x):
    # numerically robust; lowers to the EUP tanh unit (free bundle slot vs. a VPU divide)
    return 0.5 * (jnp.tanh(0.5 * x) + 1.0)


def _lstm_cell(gx_t, h, c, whh_bf16, H):
    """One LSTM cell step.

    gx_t : (B, 4H) f32  precomputed x_t @ W_ih^T + (b_ih + b_hh), PyTorch gate order i,f,g,o
    h, c : (B, H)  f32  previous hidden / cell state
    whh  : (H, 4H) bf16 transposed recurrent weights
    """
    gates = gx_t + jnp.dot(h.astype(jnp.bfloat16), whh_bf16,
                           preferred_element_type=jnp.float32)
    # NOTE: at production widths H is a multiple of 128 so these slices are lane-aligned.
    i = _sigmoid(gates[:, 0 * H:1 * H])
    f = _sigmoid(gates[:, 1 * H:2 * H])
    g = jnp.tanh(gates[:, 2 * H:3 * H])
    o = _sigmoid(gates[:, 3 * H:4 * H])
    c_new = f * c + i * g
    h_new = o * jnp.tanh(c_new)
    return h_new, c_new


# ----------------------------- Pallas kernels --------------------------------

def _embed_ln_kernel(tok_ref, pos_ref, tt_ref, ids_ref, gamma_ref, beta_ref, o_ref, *, eps):
    # fused: token + position + token-type embedding sum, then LayerNorm over H.
    # token-type ids are in {0,1}, so the gather is replaced by a lerp of the 2-row table.
    t0 = tt_ref[0:1, :]                                  # (1, H)
    t1 = tt_ref[1:2, :]                                  # (1, H)
    x = tok_ref[0] + pos_ref[...] + (t0 + ids_ref[0] * (t1 - t0))   # (S, H) f32
    mean = jnp.mean(x, axis=-1, keepdims=True)
    xc = x - mean
    var = jnp.mean(xc * xc, axis=-1, keepdims=True)
    y = (xc * lax.rsqrt(var + eps)) * gamma_ref[...] + beta_ref[...]
    o_ref[0] = y.astype(o_ref.dtype)                     # bf16 layer-boundary activation


def embed_layernorm(tok, pos_rows, ttype, type_ids, gamma, beta, eps=1e-12):
    """tok: (B,S,H) f32 token embeddings; pos_rows: (S,H); ttype: (2,H); type_ids: (B,S)."""
    B, S, H = tok.shape
    ids_f = type_ids.astype(jnp.float32).reshape(B, S, 1)
    # TODO(synk): at production (B,S) flatten to (B*S, H) row tiles of 256-512 rows and
    # fold the type ids in via scalar prefetch; the per-batch grid is fine at demo size.
    return pl.pallas_call(
        functools.partial(_embed_ln_kernel, eps=eps),
        out_shape=jax.ShapeDtypeStruct((B, S, H), jnp.bfloat16),
        grid=(B,),
        in_specs=[
            pl.BlockSpec((1, S, H), lambda b: (b, 0, 0)),
            pl.BlockSpec((S, H), lambda b: (0, 0)),
            pl.BlockSpec((2, H), lambda b: (0, 0)),
            pl.BlockSpec((1, S, 1), lambda b: (b, 0, 0)),
            pl.BlockSpec((1, H), lambda b: (0, 0)),
            pl.BlockSpec((1, H), lambda b: (0, 0)),
        ],
        out_specs=pl.BlockSpec((1, S, H), lambda b: (b, 0, 0)),
        compiler_params=pltpu.CompilerParams(dimension_semantics=("parallel",)),
    )(tok, pos_rows, ttype, ids_f, gamma.reshape(1, H), beta.reshape(1, H))


def _linear_kernel(x_ref, w_ref, b_ref, o_ref):
    o_ref[...] = jnp.dot(x_ref[...], w_ref[...],
                         preferred_element_type=jnp.float32) + b_ref[...]


def linear(x, w, b):
    """y = x @ w + b; bf16 operands, f32 accumulation."""
    M, N = x.shape[0], w.shape[1]
    # TODO(synk): add row/col grid tiling + vmem_limit_bytes before scaling to production
    # (M, K, N); whole-array blocks are fine at these demo shapes.
    return pl.pallas_call(
        _linear_kernel,
        out_shape=jax.ShapeDtypeStruct((M, N), jnp.float32),
    )(x.astype(jnp.bfloat16), w.astype(jnp.bfloat16), b.reshape(1, N).astype(jnp.float32))


def _bilstm_layer_kernel(x_ref, wihf_ref, whhf_ref, bf_ref, wihb_ref, whhb_ref, bb_ref,
                         o_ref, gxf_ref, gxb_ref, *, T, B, H):
    """One bidirectional LSTM layer, both directions interleaved in a single time loop."""
    x = x_ref[...]
    # Hoisted input projections: ONE (T*B, Din) x (Din, 4H) bf16 MXU matmul per direction
    # (bias folded in) instead of T tiny matmuls on the serial critical path.
    gxf_ref[...] = jnp.dot(x, wihf_ref[...], preferred_element_type=jnp.float32) + bf_ref[...]
    gxb_ref[...] = jnp.dot(x, wihb_ref[...], preferred_element_type=jnp.float32) + bb_ref[...]
    whh_f = whhf_ref[...]                                # (H, 4H) bf16, loop-invariant
    whh_b = whhb_ref[...]
    zeros = jnp.zeros((B, H), jnp.float32)

    def body(t, carry):
        h_f, c_f, h_b, c_b = carry
        rt = T - 1 - t
        # Two independent recurrence chains per iteration keep the MXU/EUP busy on a
        # single TensorCore (the recurrence itself is latency-bound).
        gx_f = gxf_ref[pl.ds(pl.multiple_of(t * B, B), B), :]
        gx_b = gxb_ref[pl.ds(pl.multiple_of(rt * B, B), B), :]
        h_f, c_f = _lstm_cell(gx_f, h_f, c_f, whh_f, H)
        h_b, c_b = _lstm_cell(gx_b, h_b, c_b, whh_b, H)
        # PyTorch bidirectional layout: [:, :, :H] = forward, [:, :, H:] = backward.
        o_ref[t, :, 0:H] = h_f.astype(o_ref.dtype)
        o_ref[rt, :, H:2 * H] = h_b.astype(o_ref.dtype)
        return h_f, c_f, h_b, c_b

    lax.fori_loop(0, T, body, (zeros, zeros, zeros, zeros), unroll=2)


def bilstm_layer(x2d, wih, whh, b, T, B):
    """x2d: (T*B, Din) bf16 time-major.  wih: (2, Din, 4H), whh: (2, H, 4H), b: (2, 1, 4H).
    Returns (T, B, 2H) bf16 in PyTorch bidirectional layout [fwd | bwd] (no concat)."""
    H = whh.shape[1]
    # TODO(synk): at production shapes (T*B in the thousands, H >= 768) chunk the time axis
    # (stream gx and the output in T-chunks via pltpu.emit_pipeline), consider bf16 gx, and
    # set vmem_limit_bytes explicitly so the residency fits v7x's 64 MiB VMEM; whole-array
    # residency is fine at demo shapes.  On v7x, additionally split the two directions
    # across the two TensorCores with pl.core_map / CORE_PARALLEL.
    return pl.pallas_call(
        functools.partial(_bilstm_layer_kernel, T=T, B=B, H=H),
        out_shape=jax.ShapeDtypeStruct((T, B, 2 * H), jnp.bfloat16),
        scratch_shapes=[pltpu.VMEM((T * B, 4 * H), jnp.float32),
                        pltpu.VMEM((T * B, 4 * H), jnp.float32)],
    )(x2d,
      wih[0].astype(jnp.bfloat16), whh[0].astype(jnp.bfloat16), b[0].astype(jnp.float32),
      wih[1].astype(jnp.bfloat16), whh[1].astype(jnp.bfloat16), b[1].astype(jnp.float32))


def _bilstm_last_pool_kernel(x_ref, wihf_ref, whhf_ref, bf_ref, wihb_ref, whhb_ref, bb_ref,
                             wpf_ref, wpb_ref, bp_ref, o_ref, gxb_ref, *, T, B, H):
    """Last bidirectional layer fused with the pooler.

    Only lstm_out[:, 0, :] is consumed, so:
      forward : single t = 0 step, gx matmul restricted to the first B rows of x
      backward: full reverse scan, only the final hidden state kept
      pooled  : tanh([h_fwd0 | h_bwd] @ W_pool + b) computed in-kernel (W_pool split into
                two (H, H) halves so no in-kernel concat is needed)
    The (T, B, 2H) last-layer activation is never materialized.
    """
    zeros = jnp.zeros((B, H), jnp.float32)

    # ---- forward direction: only t = 0 ----
    gx_f0 = jnp.dot(x_ref[0:B, :], wihf_ref[...],
                    preferred_element_type=jnp.float32) + bf_ref[...]
    h_f0, _ = _lstm_cell(gx_f0, zeros, zeros, whhf_ref[...], H)

    # ---- backward direction: full reverse scan ----
    gxb_ref[...] = jnp.dot(x_ref[...], wihb_ref[...],
                           preferred_element_type=jnp.float32) + bb_ref[...]
    whh_b = whhb_ref[...]

    def body(i, carry):
        rt = T - 1 - i
        gx_b = gxb_ref[pl.ds(pl.multiple_of(rt * B, B), B), :]
        return _lstm_cell(gx_b, carry[0], carry[1], whh_b, H)

    h_b, _ = lax.fori_loop(0, T, body, (zeros, zeros), unroll=2)

    # ---- fused pooler: tanh([h_f0 | h_b] @ W_pool + b_pool) ----
    pooled = (jnp.dot(h_f0.astype(jnp.bfloat16), wpf_ref[...],
                      preferred_element_type=jnp.float32)
              + jnp.dot(h_b.astype(jnp.bfloat16), wpb_ref[...],
                        preferred_element_type=jnp.float32)
              + bp_ref[...])
    o_ref[...] = jnp.tanh(pooled)


def bilstm_last_pool(x2d, wih, whh, b, pool_w, pool_b, T, B):
    """Returns pooled = tanh(lstm_out[:, 0, :] @ W_pool + b_pool), shape (B, H) f32."""
    H = whh.shape[1]
    return pl.pallas_call(
        functools.partial(_bilstm_last_pool_kernel, T=T, B=B, H=H),
        out_shape=jax.ShapeDtypeStruct((B, H), jnp.float32),
        scratch_shapes=[pltpu.VMEM((T * B, 4 * H), jnp.float32)],
    )(x2d,
      wih[0].astype(jnp.bfloat16), whh[0].astype(jnp.bfloat16), b[0].astype(jnp.float32),
      wih[1].astype(jnp.bfloat16), whh[1].astype(jnp.bfloat16), b[1].astype(jnp.float32),
      pool_w[:H].astype(jnp.bfloat16), pool_w[H:].astype(jnp.bfloat16),
      pool_b.reshape(1, H).astype(jnp.float32))


# --------------------------- pure-JAX references -----------------------------
# Mirrors the same mixed precision (bf16 matmul operands, f32 accumulation/state).

def ref_linear(x, w, b, apply_tanh=False):
    y = jnp.dot(x.astype(jnp.bfloat16), w.astype(jnp.bfloat16),
                preferred_element_type=jnp.float32) + b.reshape(1, -1)
    return jnp.tanh(y) if apply_tanh else y


def ref_embed_layernorm(tok, pos_rows, ttype, type_ids, gamma, beta, eps=1e-12):
    x = tok + pos_rows[None] + ttype[type_ids]
    mean = jnp.mean(x, axis=-1, keepdims=True)
    xc = x - mean
    var = jnp.mean(xc * xc, axis=-1, keepdims=True)
    return (xc * lax.rsqrt(var + eps)) * gamma.reshape(1, 1, -1) + beta.reshape(1, 1, -1)


def ref_bilstm_layer(x_tm, wih, whh, b):
    T, B, Din = x_tm.shape
    H = whh.shape[1]
    x2d = x_tm.reshape(T * B, Din).astype(jnp.bfloat16)
    outs = []
    for d, reverse in ((0, False), (1, True)):
        gx = (jnp.dot(x2d, wih[d].astype(jnp.bfloat16),
                      preferred_element_type=jnp.float32) + b[d]).reshape(T, B, 4 * H)
        whh_bf = whh[d].astype(jnp.bfloat16)

        def step(carry, gx_t):
            h, c = _lstm_cell(gx_t, carry[0], carry[1], whh_bf, H)
            return (h, c), h

        init = (jnp.zeros((B, H), jnp.float32), jnp.zeros((B, H), jnp.float32))
        _, ys = lax.scan(step, init, gx, reverse=reverse)
        outs.append(ys)
    return jnp.concatenate(outs, axis=-1)                # (T, B, 2H)


# ---------------------------------- model ------------------------------------

def init_params(key, cfg):
    H, F = cfg["hidden"], cfg["img_feat"]
    ks = iter(jax.random.split(key, 64))

    def nrm(shape, scale=0.02):
        return (scale * jax.random.normal(next(ks), shape)).astype(jnp.float32)

    params = {
        "word_emb": nrm((cfg["vocab"], H)),
        "pos_emb": nrm((cfg["max_pos"], H)),
        "type_emb": nrm((2, H)),
        "ln_gamma": jnp.ones((H,), jnp.float32),
        "ln_beta": jnp.zeros((H,), jnp.float32),
        "img_w": nrm((F, H)), "img_b": nrm((H,)),
        "pool_w": nrm((2 * H, H)), "pool_b": nrm((H,)),
        "lstm": [],
    }
    for layer_idx in range(cfg["lstm_layers"]):
        Din = H if layer_idx == 0 else 2 * H
        params["lstm"].append({
            "wih": nrm((2, Din, 4 * H), 0.1),   # [fwd, bwd] transposed W_ih (gate order i,f,g,o)
            "whh": nrm((2, H, 4 * H), 0.1),     # [fwd, bwd] transposed W_hh
            "b":   nrm((2, 1, 4 * H), 0.1),     # [fwd, bwd] combined b_ih + b_hh
        })
    return params


def multimodal_bert_encoder_forward(params, cfg, input_txt, attention_mask, segment,
                                    global_image, region_image, use_pallas=True):
    B = input_txt.shape[0]
    H = cfg["hidden"]
    G, R = cfg["global_image_embeds"], cfg["region_image_embeds"]
    n_img = G + R
    Si = n_img + 2
    Lt = input_txt.shape[1]

    # NOTE: the reference builds an extended attention mask that is never consumed by the
    # LSTM path; it is dead code and omitted here (attention_mask is accepted but unused).
    del attention_mask

    # ---- MixImageEncoder stand-in ----
    # TODO(synk): MixImageEncoder is not defined in the reference snippet; using a single
    # deterministic linear projection of the concatenated per-stream image features.
    F = global_image.shape[-1]
    img_feats = jnp.concatenate([global_image, region_image], axis=1).reshape(B * n_img, F)
    lin = linear if use_pallas else ref_linear
    img = lin(img_feats, params["img_w"], params["img_b"]).reshape(B, n_img, H)

    word, pos, ttype = params["word_emb"], params["pos_emb"], params["type_emb"]

    # token embeddings for the concatenated (image ++ text) stream
    cls_e = jnp.broadcast_to(word[cfg["cls_id"]][None, None, :], (B, 1, H))
    sep_e = jnp.broadcast_to(word[cfg["sep_id"]][None, None, :], (B, 1, H))
    tok = jnp.concatenate([cls_e, img, sep_e, word[input_txt]], axis=1)     # (B, S, H)

    # per-position table (shared across batch): image stream positions restart at 0 and so
    # do text positions — this matches the reference's two separate embedding modules.
    pos_rows = jnp.concatenate([pos[:Si], pos[:Lt]], axis=0)                # (S, H)
    img_tok = jnp.concatenate([jnp.zeros((B, G + 1), jnp.int32),
                               jnp.ones((B, R + 1), jnp.int32)], axis=1)
    type_ids = jnp.concatenate([img_tok, segment], axis=1)                  # (B, S)

    if use_pallas:
        # fused embedding-sum + LayerNorm (per-position, so fusing the two streams is
        # exactly equivalent to the reference's separate img/txt embedding modules).
        enc = embed_layernorm(tok, pos_rows, ttype, type_ids,
                              params["ln_gamma"], params["ln_beta"])        # (B, S, H) bf16
        T = enc.shape[1]
        x2d = jnp.transpose(enc, (1, 0, 2)).reshape(T * B, H)               # time-major, bf16
        for layer in params["lstm"][:-1]:
            x2d = bilstm_layer(x2d, layer["wih"], layer["whh"], layer["b"],
                               T, B).reshape(T * B, 2 * H)                  # free reshape
        last = params["lstm"][-1]
        # last layer + pooler fused; pooled = tanh(lstm_out[:, 0, :] @ W_pool + b_pool)
        return bilstm_last_pool(x2d, last["wih"], last["whh"], last["b"],
                                params["pool_w"], params["pool_b"], T, B)
    else:
        enc = ref_embed_layernorm(tok, pos_rows, ttype, type_ids,
                                  params["ln_gamma"], params["ln_beta"])    # (B, S, H) f32
        x = jnp.transpose(enc, (1, 0, 2))                                   # (T, B, H)
        for layer in params["lstm"]:
            x = ref_bilstm_layer(x, layer["wih"], layer["whh"], layer["b"])
        first_tok = x[0]                                                    # (B, 2H)
        return ref_linear(first_tok, params["pool_w"], params["pool_b"], apply_tanh=True)


# ----------------------------------- main -------------------------------------

if __name__ == "__main__":
    cfg = dict(hidden=32, vocab=64, max_pos=64, img_feat=16,
               global_image_embeds=3, region_image_embeds=3,
               lstm_layers=2, cls_id=1, sep_id=2, txt_len=8, batch=2)

    key = jax.random.PRNGKey(0)
    kp, k1, k2, k3, k4 = jax.random.split(key, 5)
    params = init_params(kp, cfg)

    B, Lt = cfg["batch"], cfg["txt_len"]
    input_txt = jax.random.randint(k1, (B, Lt), 0, cfg["vocab"], dtype=jnp.int32)
    segment = jax.random.randint(k2, (B, Lt), 0, 2, dtype=jnp.int32)
    attention_mask = jnp.ones((B, Lt), jnp.int32)
    global_image = jax.random.normal(k3, (B, cfg["global_image_embeds"], cfg["img_feat"]),
                                     jnp.float32)
    region_image = jax.random.normal(k4, (B, cfg["region_image_embeds"], cfg["img_feat"]),
                                     jnp.float32)

    out = multimodal_bert_encoder_forward(
        params, cfg, input_txt, attention_mask, segment, global_image, region_image,
        use_pallas=True)
    out = jax.block_until_ready(out)

    ref = multimodal_bert_encoder_forward(
        params, cfg, input_txt, attention_mask, segment, global_image, region_image,
        use_pallas=False)
    ref = jax.block_until_ready(ref)

    assert out.shape == (B, cfg["hidden"])
    max_err = float(jnp.max(jnp.abs(out - ref)))
    assert max_err < 5e-3, f"max_err={max_err}"
    print("KERNEL_OK")
</pallas_src>

<mosaic_0001>
module attributes {stable_mosaic.version = 11 : i64} {
  func.func @_linear_kernel(%arg0: memref<12x16xbf16, #tpu.memory_space<vmem>>, %arg1: memref<16x32xbf16, #tpu.memory_space<vmem>>, %arg2: memref<1x32xf32, #tpu.memory_space<vmem>>, %arg3: memref<12x32xf32, #tpu.memory_space<vmem>>) attributes {dimension_semantics = [], scalar_prefetch = 0 : i64, scratch_operands = 0 : i64, tpu.core_type = #tpu.core_type<tc>} {
    %c0 = arith.constant 0 : index
    %c0_0 = arith.constant 0 : index
    %0 = vector.load %arg0[%c0, %c0_0] : memref<12x16xbf16, #tpu.memory_space<vmem>>, vector<12x16xbf16>
    %c0_1 = arith.constant 0 : index
    %c0_2 = arith.constant 0 : index
    %1 = vector.load %arg1[%c0_1, %c0_2] : memref<16x32xbf16, #tpu.memory_space<vmem>>, vector<16x32xbf16>
    %cst = arith.constant dense<0.000000e+00> : vector<12x32xf32>
    %2 = tpu.matmul %0, %1, %cst {dimension_numbers = #tpu.dot_dimension_numbers<[1], [0], [0], [1], [0, 0, 1, 1], [], []>} : vector<12x16xbf16>, vector<16x32xbf16>, vector<12x32xf32> -> vector<12x32xf32>
    %c0_3 = arith.constant 0 : index
    %c0_4 = arith.constant 0 : index
    %3 = vector.load %arg2[%c0_3, %c0_4] : memref<1x32xf32, #tpu.memory_space<vmem>>, vector<1x32xf32>
    %4 = vector.broadcast %3 : vector<1x32xf32> to vector<12x32xf32>
    %5 = arith.addf %2, %4 : vector<12x32xf32>
    %c0_5 = arith.constant 0 : index
    %c0_6 = arith.constant 0 : index
    %6 = vector.load %arg3[%c0_5, %c0_6] : memref<12x32xf32, #tpu.memory_space<vmem>>, vector<12x32xf32>
    tpu.vector_store %arg3[%c0_5, %c0_6], %5 {strides = array<i32>} : memref<12x32xf32, #tpu.memory_space<vmem>>, vector<12x32xf32>,
    return
  }
}

</mosaic_0001>

<bundles_post_ra>
// kernel: tpu_custom_call.1
= control target key start
LH: loop header
LB: loop body
LE: loop exit
PB: predicated region body
PF: predicated region fallthrough
CT: control target
= control target key end

     0   :  { %8 = vsyncpa [#allocation3], 0  ;;  %s296_s0 = inlined_call_operand.hbm [shape: bf16[12,16], index: 0, kind: input, shape index: {}]   ;;  %s297_s1 = inlined_call_operand.hbm [shape: bf16[16,32], index: 1, kind: input, shape index: {}]   ;;  %s298_s2 = inlined_call_operand.vmem [shape: f32[1,32], index: 2, kind: input, shape index: {}]   ;;  %s299_s3 = inlined_call_operand.hbm [shape: f32[12,32], index: 3, kind: output, shape index: {}]  }
   0x1   :  { %9 = vsyncpa [#allocation6], 0 }
   0x2   :  { %10 = vsyncpa [#allocation4], 0  ;;  %s228_s12 = smov [#allocation2]   ;;  %s156_s16 = scalar_lea.hbm %s296_s0, 128 }
   0x3   :  { %s16_s13 = sshll.u32 %s228_s12, 4  ;;  %p157_p0 = scmp.ne.s32.totalorder %s296_s0, %s156_s16  ;;  %s17_s13 = int_to_ptr.vmem [resolvable:$true] %s16_s13 }
   0x4   :  { %p160_p1 = scmp.lt.u32.totalorder %s156_s16, %s296_s0 }
   0x6   :  { %p162_p2 = pnand %p160_p1, %p157_p0 }
   0x8   :  { %165 = shalt.err (!%p162_p2)
}
   0x9   :  { %s166_s21 = scalar_lea.vmem %s17_s13, 128  ;;  %p171_p4 = scmp.lt.s32.totalorder %s17_s13, %s17_s13 }
   0xa   :  { %p167_p3 = scmp.ne.s32.totalorder %s17_s13, %s166_s21  ;;  %p172_p5 = scmp.lt.s32.totalorder %s166_s21, %s166_s21 }
   0xc   :  { %p173_p6 = por %p172_p5, %p171_p4 }
   0xe   :  { %p174_p7 = pnand %p173_p6, %p167_p3 }
  0x10   :  { %177 = shalt.err (!%p174_p7)
}
  0x11   :  { %s229_s22 = smov 64   ;;  %s230_s23 = smov 4  }
  0x12   :  { %22 = dma.hbm_to_vmem [thread:$0]  %s296_s0, 128, %s17_s13, [#allocation3], %s229_s22, %s229_s22, %s230_s23  }
  0x13   :  { %s231_s26 = smov [#allocation5]   ;;  %s178_s30 = scalar_lea.hbm %s297_s1, 128 }
  0x14   :  { %s28_s27 = sshll.u32 %s231_s26, 4  ;;  %p179_p8 = scmp.ne.s32.totalorder %s297_s1, %s178_s30  ;;  %s29_s27 = int_to_ptr.vmem [resolvable:$true] %s28_s27 }
  0x15   :  { %p182_p9 = scmp.lt.u32.totalorder %s178_s30, %s297_s1 }
  0x17   :  { %p184_p10 = pnand %p182_p9, %p179_p8 }
  0x19   :  { %187 = shalt.err (!%p184_p10)
}
  0x1a   :  { %s188_s8 = scalar_lea.vmem %s29_s27, 128  ;;  %p193_p12 = scmp.lt.s32.totalorder %s29_s27, %s29_s27 }
  0x1b   :  { %p189_p11 = scmp.ne.s32.totalorder %s29_s27, %s188_s8  ;;  %p194_p13 = scmp.lt.s32.totalorder %s188_s8, %s188_s8 }
  0x1d   :  { %p195_p0 = por %p194_p13, %p193_p12 }
  0x1f   :  { %p196_p1 = pnand %p195_p0, %p189_p11 }
  0x21   :  { %199 = shalt.err (!%p196_p1)
}
  0x22   :  { %34 = dma.hbm_to_vmem [thread:$0]  %s297_s1, 128, %s29_s27, [#allocation6], %s229_s22, %s229_s22, %s230_s23  }
  0x23   :  { %222 = dma.done.wait [#allocation3], 128  }
  0x24   :  { %223 = vsyncadd [#allocation3], 4294967168 }
  0x25   :  { %224 = dma.done.wait [#allocation6], 128  }
  0x26   :  { %225 = vsyncadd [#allocation6], 4294967168  ;;  %v232_v0 = vmov 0.0   ;;  %vm233_vm0 = vmmov 0   ;;  %v154_v1 = vld [vmem:[#allocation5] sm:$0xff]   ;;  %vm66_vm1 = vcmask 130048  }
  0x27   :  { %139 = vmatprep.subr.bf16.mxu0 %v232_v0  ;;  %141 = vmatprep.mubr.msk.bf16.mxu0 %vm233_vm0, %v232_v0  ;;  %v155_v2 = vld [vmem:[#allocation2] sm:$0x3f]   ;;  %s234_s12 = smov [#allocation7]   ;;  %vm111_vm2 = vcmask 261120   ;;  %vm113_vm3 = vcmask 257024  }
  0x28   :  { %140 = vmatpush3.bf16.msra.mxu0 %v154_v1  ;;  %v133_v3 = vld [vmem:[%s298_s2] ss:$0 sm:$0xff]  ;;  %s120_s13 = sshll.u32 %s234_s12, 4  ;;  %s121_s13 = int_to_ptr.vmem [resolvable:$true] %s120_s13 }
  0x29   :  { %s200_s1 = scalar_lea.vmem %s121_s13, 256  ;;  %p205_p3 = scmp.lt.s32.totalorder %s121_s13, %s121_s13 }
  0x2a   :  { %p201_p2 = scmp.ne.s32.totalorder %s121_s13, %s200_s1  ;;  %p206_p4 = scmp.lt.s32.totalorder %s200_s1, %s200_s1 }
  0x2b   :  { %142 = vmatmul.mubr.msk.bf16.vlgmr.msra.gmra.mrb[0].mxu0 %vm66_vm1, %v155_v2 }
  0x2c   :  { %p207_p5 = por %p206_p4, %p205_p3 }
  0x2e   :  { %p208_p6 = pnand %p207_p5, %p201_p2 }
  0xfe   :  { %v104_v4 = vpop.f32.mrb[0].mxu0 }
  0xff   :  { %v105_v5 = vadd.f32 %v133_v3, %v104_v4  ;;  %v143_v6 = vpop.f32.mrb[1].mxu0 }
 0x100   :  { %v107_v7 = vpop.f32.mrb[2].mxu0 }
 0x101   :  { %112 = vst.msk [vmem:[#allocation7] sm:$0xff] %vm111_vm2, %v105_v5  ;;  %v108_v8 = vadd.f32 %v133_v3, %v107_v7  ;;  %v144_v9 = vpop.f32.mrb[3].mxu0 }
 0x103   :  { %114 = vst.msk [vmem:[#allocation7 + $0x8] sm:$0xf] %vm113_vm3, %v108_v8 }
 0x104   :  { %211 = shalt.err (!%p208_p6)
}
 0x105   :  { %s212_s15 = scalar_lea.hbm %s299_s3, 256 }
 0x106   :  { %p213_p7 = scmp.ne.s32.totalorder %s299_s3, %s212_s15  ;;  %p216_p8 = scmp.lt.u32.totalorder %s212_s15, %s299_s3 }
 0x108   :  { %p218_p9 = pnand %p216_p8, %p213_p7 }
 0x10a   :  { %221 = shalt.err (!%p218_p9)
}
 0x10b   :  { %s235_s20 = smov 128   ;;  %s236_s21 = smov 8  }
 0x10c   :  { %126 = dma.vmem_to_hbm [thread:$0]  %s121_s13, 256, %s299_s3, [#allocation4], %s235_s20, %s235_s20, %s236_s21  }
 0x10d   :  { %226 = dma.done.wait [#allocation4], 256  }
 0x10e   :  { %227 = vsyncadd [#allocation4], 4294967040 }
 0x10f   :  { %130 = vsyncpa [#allocation3], 1 }
 0x110   :  { %131 = vsyncpa [#allocation6], 1 }
 0x111   :  { %132 = vsyncpa [#allocation4], 1 }

</bundles_post_ra>
